<compile_context>
chip_gen: v7x
topology: tpu7x:2x2x1
jax: 0.10.0
libtpu: 0.0.40
codegen_flags: <defaults>
</compile_context>

<pallas_src>
import jax
import jax.numpy as jnp
from jax.experimental import pallas as pl
from jax.experimental.pallas import tpu as pltpu


def _mlp_kernel(xT_ref, w1_ref, b1_ref, w2_ref, b2_ref, outT_ref):
    # Layout (batch on the lane axis):
    #   xT: (F, TB), w1: (H, F), b1: (H, 1), w2: (O, H), b2: (O, 1), outT: (O, TB)
    xT = xT_ref[...]
    # hidden^T = relu(W1 @ x^T + b1)
    h = jnp.dot(w1_ref[...], xT, preferred_element_type=jnp.float32)    # (H, TB)
    h = jnp.maximum(h + b1_ref[...], 0.0)                               # bias + ReLU on VPU
    # out^T = W2 @ hidden^T + b2
    o = jnp.dot(w2_ref[...], h, preferred_element_type=jnp.float32)     # (O, TB)
    outT_ref[...] = (o + b2_ref[...]).astype(outT_ref.dtype)


def _cost_estimate(B, F, H, O):
    flops = 2 * B * (F * H + H * O)
    bytes_accessed = 4 * (B * F + H * F + H + O * H + O + B * O)
    return pl.CostEstimate(flops=flops, transcendentals=0,
                           bytes_accessed=bytes_accessed)


def net_forward(x, w1, b1, w2, b2, *, block_b=4096):
    """Forward pass of `Net`.

    x : (B, F) float32
    w1: (H, F) float32   (PyTorch nn.Linear layout: (out_features, in_features))
    b1: (H,)   float32
    w2: (O, H) float32
    b2: (O,)   float32
    returns (B, O) float32
    """
    B, F = x.shape
    H = w1.shape[0]
    O = w2.shape[0]

    # Single layout transpose in the wrapper: batch becomes the lane axis.
    xT = x.T                       # (F, B)
    b1c = b1.reshape(H, 1)
    b2c = b2.reshape(O, 1)

    if B <= block_b:
        # ---- Single-tile path: no grid, every operand one full VMEM block. ----
        outT = pl.pallas_call(
            _mlp_kernel,
            out_shape=jax.ShapeDtypeStruct((O, B), jnp.float32),
            in_specs=[pl.BlockSpec(memory_space=pltpu.MemorySpace.VMEM)] * 5,
            out_specs=pl.BlockSpec(memory_space=pltpu.MemorySpace.VMEM),
            cost_estimate=_cost_estimate(B, F, H, O),
        )(xT, w1, b1c, w2, b2c)
    else:
        # ---- Batch-tiled path: tile only the (lane) batch axis. ----
        # No padding / output slicing: Pallas masks the partial edge block.
        tb = block_b
        outT = pl.pallas_call(
            _mlp_kernel,
            out_shape=jax.ShapeDtypeStruct((O, B), jnp.float32),
            grid=(pl.cdiv(B, tb),),
            in_specs=[
                pl.BlockSpec((F, tb), lambda i: (0, i)),   # x^T : tiled over batch lanes
                pl.BlockSpec((H, F), lambda i: (0, 0)),    # W1  : resident
                pl.BlockSpec((H, 1), lambda i: (0, 0)),    # b1  : resident
                pl.BlockSpec((O, H), lambda i: (0, 0)),    # W2  : resident
                pl.BlockSpec((O, 1), lambda i: (0, 0)),    # b2  : resident
            ],
            out_specs=pl.BlockSpec((O, tb), lambda i: (0, i)),
            compiler_params=pltpu.CompilerParams(
                dimension_semantics=("parallel",),         # batch split across TCs (v7x)
            ),
            cost_estimate=_cost_estimate(B, F, H, O),
        )(xT, w1, b1c, w2, b2c)

    return outT.T                  # back to (B, O)


if __name__ == "__main__":
    # Shapes implied by the notebook: n_feature=2, n_output=2, batch=200
    # (two 100-sample clusters); pick n_hidden=32.
    n_feature, n_hidden, n_output = 2, 32, 2
    batch = 200

    key = jax.random.PRNGKey(0)
    k_x, k_w1, k_b1, k_w2, k_b2 = jax.random.split(key, 5)

    # PyTorch-like Linear init: uniform(-1/sqrt(fan_in), 1/sqrt(fan_in)),
    # weights stored in nn.Linear layout (out_features, in_features).
    lim1 = 1.0 / jnp.sqrt(jnp.float32(n_feature))
    lim2 = 1.0 / jnp.sqrt(jnp.float32(n_hidden))
    w1 = jax.random.uniform(k_w1, (n_hidden, n_feature), jnp.float32, -lim1, lim1)
    b1 = jax.random.uniform(k_b1, (n_hidden,), jnp.float32, -lim1, lim1)
    w2 = jax.random.uniform(k_w2, (n_output, n_hidden), jnp.float32, -lim2, lim2)
    b2 = jax.random.uniform(k_b2, (n_output,), jnp.float32, -lim2, lim2)

    def ref_fn(xv):
        return jnp.maximum(xv @ w1.T + b1, 0.0) @ w2.T + b2

    # Notebook-style input: two Gaussian clusters at +2 and -2.
    x = jax.random.normal(k_x, (batch, n_feature), jnp.float32)
    x = x.at[: batch // 2].add(2.0).at[batch // 2:].add(-2.0)

    # 1) Default path (B <= block_b): single no-grid pallas_call.
    out = jax.block_until_ready(net_forward(x, w1, b1, w2, b2))
    assert out.shape == (batch, n_output)
    assert jnp.allclose(out, ref_fn(x), atol=1e-5, rtol=1e-5), \
        "single-tile path mismatch vs reference"

    # 2) Force the batch-tiled path (grid=(2,), partial edge block masked by
    #    Pallas, weights resident, batch axis parallel).
    out_tiled = jax.block_until_ready(
        net_forward(x, w1, b1, w2, b2, block_b=128))
    assert out_tiled.shape == (batch, n_output)
    assert jnp.allclose(out_tiled, ref_fn(x), atol=1e-5, rtol=1e-5), \
        "tiled path mismatch vs reference"

    print("KERNEL_OK")
</pallas_src>

<mosaic_0001>
module attributes {stable_mosaic.version = 11 : i64} {
  func.func @_mlp_kernel(%arg0: memref<2x200xf32, #tpu.memory_space<vmem>>, %arg1: memref<32x2xf32, #tpu.memory_space<vmem>>, %arg2: memref<32x1xf32, #tpu.memory_space<vmem>>, %arg3: memref<2x32xf32, #tpu.memory_space<vmem>>, %arg4: memref<2x1xf32, #tpu.memory_space<vmem>>, %arg5: memref<2x200xf32, #tpu.memory_space<vmem>>) attributes {dimension_semantics = [], scalar_prefetch = 0 : i64, scratch_operands = 0 : i64, tpu.core_type = #tpu.core_type<tc>} {
    %c0 = arith.constant 0 : index
    %c0_0 = arith.constant 0 : index
    %0 = vector.load %arg0[%c0, %c0_0] : memref<2x200xf32, #tpu.memory_space<vmem>>, vector<2x200xf32>
    %c0_1 = arith.constant 0 : index
    %c0_2 = arith.constant 0 : index
    %1 = vector.load %arg1[%c0_1, %c0_2] : memref<32x2xf32, #tpu.memory_space<vmem>>, vector<32x2xf32>
    %cst = arith.constant dense<0.000000e+00> : vector<32x200xf32>
    %2 = tpu.matmul %1, %0, %cst {dimension_numbers = #tpu.dot_dimension_numbers<[1], [0], [0], [1], [0, 0, 1, 1], [], []>} : vector<32x2xf32>, vector<2x200xf32>, vector<32x200xf32> -> vector<32x200xf32>
    %c0_3 = arith.constant 0 : index
    %c0_4 = arith.constant 0 : index
    %3 = vector.load %arg2[%c0_3, %c0_4] : memref<32x1xf32, #tpu.memory_space<vmem>>, vector<32x1xf32>
    %4 = vector.broadcast %3 : vector<32x1xf32> to vector<32x200xf32>
    %5 = arith.addf %2, %4 : vector<32x200xf32>
    %cst_5 = arith.constant 0.000000e+00 : f32
    %6 = vector.broadcast %cst_5 : f32 to vector<32x200xf32>
    %7 = arith.maximumf %5, %6 : vector<32x200xf32>
    %c0_6 = arith.constant 0 : index
    %c0_7 = arith.constant 0 : index
    %8 = vector.load %arg3[%c0_6, %c0_7] : memref<2x32xf32, #tpu.memory_space<vmem>>, vector<2x32xf32>
    %cst_8 = arith.constant dense<0.000000e+00> : vector<2x200xf32>
    %9 = tpu.matmul %8, %7, %cst_8 {dimension_numbers = #tpu.dot_dimension_numbers<[1], [0], [0], [1], [0, 0, 1, 1], [], []>} : vector<2x32xf32>, vector<32x200xf32>, vector<2x200xf32> -> vector<2x200xf32>
    %c0_9 = arith.constant 0 : index
    %c0_10 = arith.constant 0 : index
    %10 = vector.load %arg4[%c0_9, %c0_10] : memref<2x1xf32, #tpu.memory_space<vmem>>, vector<2x1xf32>
    %11 = vector.broadcast %10 : vector<2x1xf32> to vector<2x200xf32>
    %12 = arith.addf %9, %11 : vector<2x200xf32>
    %c0_11 = arith.constant 0 : index
    %c0_12 = arith.constant 0 : index
    %13 = vector.load %arg5[%c0_11, %c0_12] : memref<2x200xf32, #tpu.memory_space<vmem>>, vector<2x200xf32>
    tpu.vector_store %arg5[%c0_11, %c0_12], %12 {strides = array<i32>} : memref<2x200xf32, #tpu.memory_space<vmem>>, vector<2x200xf32>,
    return
  }
}

</mosaic_0001>

<bundles_post_ra>
// kernel: tpu_custom_call.1
= control target key start
LH: loop header
LB: loop body
LE: loop exit
PB: predicated region body
PF: predicated region fallthrough
CT: control target
= control target key end

     0   :  { %vm72_vm0 = vcmask 1041408   ;;  %v330_v2 = vmov 0.0   ;;  %vm59_vm1 = vcmask 15360   ;;  %v331_v4 = vmov 0   ;;  %s416_s0 = inlined_call_operand.vmem [shape: f32[2,200], index: 0, kind: input, shape index: {}]   ;;  %s417_s1 = inlined_call_operand.vmem [shape: f32[32,2], index: 1, kind: input, shape index: {}]   ;;  %s418_s2 = inlined_call_operand.vmem [shape: f32[32,1], index: 2, kind: input, shape index: {}]   ;;  %s419_s3 = inlined_call_operand.vmem [shape: f32[2,32], index: 3, kind: input, shape index: {}]   ;;  %s420_s4 = inlined_call_operand.vmem [shape: f32[2,1], index: 4, kind: input, shape index: {}]   ;;  %s421_s5 = inlined_call_operand.hbm [shape: f32[2,200], index: 5, kind: output, shape index: {}]  }
   0x1   :  { %v284_v0 = vld.sshfl [vmem:[%s416_s0] sm:$0x33 pattern:$0x76325410]  ;;  %141 = vmatprep.mubr.f32.mxu0 %v330_v2  ;;  %249 = vmatprep.mubr.f32.mxu1 %v330_v2  ;;  %v28_v6 = vld [vmem:[%s418_s2 + $0x10] sm:$0xff]  ;;  %v27_v7 = vld [vmem:[%s418_s2 + $0x8] sm:$0xff] }
   0x2   :  { %v58_v1 = vcombine.high %v284_v0, %v284_v0  ;;  %v22_v3 = vld [vmem:[%s417_s1] sm:$0xff]  ;;  %304 = vset.pattern.permute.xlu0 %v331_v4  ;;  %305 = vset.pattern.permute.xlu1 %v331_v4 }
   0x3   :  { %v26_v5 = vld [vmem:[%s418_s2] sm:$0xff]  ;;  %42 = vperm.xlu1 %305, %v28_v6  }
   0x4   :  { %285 = vmatprep.subr.msk.mxu0 %vm72_vm0, %v58_v1  ;;  %32 = vperm.xlu0 %304, %v26_v5  }
   0x5   :  { %286 = vmatpush1.msk.msra.mxu0 %vm72_vm0, %v284_v0 }
   0x6   :  { %10 = vsyncpa [#allocation3], 0  ;;  %287 = vmatmul.mubr.msk.f32.vlgmr.msra.gmra.mrb[0].mxu0 %vm59_vm1, %v22_v3  ;;  %v29_v8 = vld [vmem:[%s418_s2 + $0x18] sm:$0xff]  ;;  %v23_v9 = vld [vmem:[%s417_s1 + $0x8] sm:$0xff]  ;;  %vm181_vm2 = vcmask 261120   ;;  %v262_v48 = vlaneseq  ;;  %vm267_vm3 = vcmask 584706  }
   0x7   :  { %147 = vmatprep.mubr.f32.mxu0 %v330_v2  ;;  %v175_v10 = vld [vmem:[%s420_s4] sm:$0x3]  ;;  %47 = vperm.xlu1 %305, %v29_v8   ;;  %v24_v11 = vld [vmem:[%s417_s1 + $0x10] sm:$0xff]  ;;  %v25_v12 = vld [vmem:[%s417_s1 + $0x18] sm:$0xff]  ;;  %v332_v46 = vmov 1983009808  }
   0x8   :  { %37 = vperm.xlu0 %304, %v27_v7   ;;  %v174_v45 = vld [vmem:[%s419_s3] sm:$0x3]  ;;  %v260_v47 = vunpack.c.l.s4 %v332_v46  ;;  %v263_v50 = vshrl.u32 %v262_v48, 7  ;;  %s333_s11 = smov [#allocation2]   ;;  %vm268_vm4 = vmor %vm267_vm3, %vm72_vm0 }
   0x9   :  { %s276_s12 = sshll.u32 %s333_s11, 4  ;;  %s277_s12 = int_to_ptr.vmem [resolvable:$true] %s276_s12 }
   0xa   :  { %288 = vmatmul.mubr.msk.f32.gmra.mrb[2].mxu0 %vm59_vm1, %v23_v9  ;;  %v261_v49 = vunpack.c.0.s8 %v260_v47  ;;  %s306_s3 = scalar_lea.vmem %s277_s12, 64  ;;  %p311_p1 = scmp.lt.s32.totalorder %s277_s12, %s277_s12 }
   0xb   :  { %153 = vmatprep.mubr.f32.mxu0 %v330_v2  ;;  %p307_p0 = scmp.ne.s32.totalorder %s277_s12, %s306_s3  ;;  %p312_p2 = scmp.lt.s32.totalorder %s306_s3, %s306_s3 }
   0xc   :  { %178 = vperm.xlu0 %304, %v175_v10   ;;  %v264_v56 = vsub.s32 %v261_v49, %v263_v50 }
   0xd   :  { %p313_p3 = por %p312_p2, %p311_p1 }
   0xe   :  { %289 = vmatmul.mubr.msk.f32.gmra.mrb[4].mxu0 %vm59_vm1, %v24_v11 }
   0xf   :  { %159 = vmatprep.mubr.f32.mxu0 %v330_v2  ;;  %p314_p4 = pnand %p313_p3, %p307_p0 }
  0x12   :  { %290 = vmatmul.mubr.msk.f32.gmra.mrb[6].mxu0 %vm59_vm1, %v25_v12 }
  0x82   :  { %v43_v22 = vpop.permute.xlu1 %42 }
  0x83   :  { %v33_v13 = vpop.permute.xlu0 %32 }
  0x86   :  { %v48_v33 = vpop.permute.xlu1 %47 }
  0x87   :  { %v38_v17 = vpop.permute.xlu0 %37 }
  0x8b   :  { %v179_v51 = vpop.permute.xlu0 %178 }
  0xd9   :  { %v143_v14 = vpop.f32.mrb[0].mxu0 }
  0xda   :  { %v145_v15 = vpop.f32.mrb[1].mxu0  ;;  %v144_v16 = vadd.f32 %v143_v14, %v33_v13 }
  0xdb   :  { %v146_v18 = vadd.f32 %v145_v15, %v33_v13 }
  0xdc   :  { %v166_v24 = vmax.f32 %v144_v16, 0.0 }
  0xdd   :  { %v149_v19 = vpop.f32.mrb[2].mxu0  ;;  %v167_v26 = vmax.f32 %v146_v18, 0.0 }
  0xde   :  { %v150_v20 = vadd.f32 %v149_v19, %v38_v17  ;;  %v151_v21 = vpop.f32.mrb[3].mxu0 }
  0xdf   :  { %v152_v23 = vadd.f32 %v151_v21, %v38_v17 }
  0xe0   :  { %v168_v25 = vmax.f32 %v150_v20, 0.0 }
  0xe1   :  { %v169_v27 = vmax.f32 %v152_v23, 0.0  ;;  %v155_v28 = vpop.f32.mrb[4].mxu0 }
  0xe2   :  { %v157_v29 = vpop.f32.mrb[5].mxu0  ;;  %v294_v30 = vpack.c.bf16 %v168_v25, %v166_v24  ;;  %v156_v32 = vadd.f32 %v155_v28, %v43_v22 }
  0xe3   :  { %v292_v31 = vpack.c.bf16 %v169_v27, %v167_v26  ;;  %v158_v34 = vadd.f32 %v157_v29, %v43_v22 }
  0xe4   :  { %v170_v39 = vmax.f32 %v156_v32, 0.0 }
  0xe5   :  { %v161_v35 = vpop.f32.mrb[6].mxu0  ;;  %293 = vmatprep.subr.bf16.mxu1 %v292_v31  ;;  %v171_v41 = vmax.f32 %v158_v34, 0.0 }
  0xe6   :  { %v162_v36 = vadd.f32 %v161_v35, %v48_v33  ;;  %v163_v37 = vpop.f32.mrb[7].mxu0  ;;  %295 = vmatpush1.bf16.msra.mxu1 %v294_v30 }
  0xe7   :  { %v164_v38 = vadd.f32 %v163_v37, %v48_v33 }
  0xe8   :  { %v172_v40 = vmax.f32 %v162_v36, 0.0 }
  0xe9   :  { %v173_v42 = vmax.f32 %v164_v38, 0.0 }
  0xea   :  { %v298_v43 = vpack.c.bf16 %v172_v40, %v170_v39 }
  0xeb   :  { %v296_v44 = vpack.c.bf16 %v173_v42, %v171_v41 }
  0xed   :  { %297 = vmatprep.subr.bf16.mxu1 %v296_v44 }
  0xee   :  { %299 = vmatpush1.bf16.msra.mxu1 %v298_v43 }
  0xf1   :  { %291 = vmatmul.mubr.msk.f32.vlgmr.msra.gmra.mrb[0].mxu1 %vm181_vm2, %v174_v45 }
 0x1c4   :  { %v251_v52 = vpop.f32.mrb[0].mxu1 }
 0x1c5   :  { %v252_v53 = vadd.f32 %v251_v52, %v179_v51  ;;  %v253_v54 = vpop.f32.mrb[1].mxu1 }
 0x1c6   :  { %v254_v55 = vadd.f32 %v253_v54, %v179_v51 }
 0x1c8   :  { %v258_v57 = vcombine.low %v252_v53, %v254_v55 }
 0x1ca   :  { %v265_v58 = vrot.slane %v258_v57, %v264_v56 }
 0x1cc   :  { %269 = vst.msk [vmem:[#allocation2] sm:$0xf] %vm268_vm4, %v265_v58 }
 0x1cd   :  { %317 = shalt.err (!%p314_p4)
}
 0x1ce   :  { %s318_s15 = scalar_lea.hbm %s421_s5, 64 }
 0x1cf   :  { %p319_p5 = scmp.ne.s32.totalorder %s421_s5, %s318_s15  ;;  %p322_p6 = scmp.lt.u32.totalorder %s318_s15, %s421_s5 }
 0x1d1   :  { %p324_p7 = pnand %p322_p6, %p319_p5 }
 0x1d3   :  { %327 = shalt.err (!%p324_p7)
}
 0x1d4   :  { %279 = dma.vmem_to_hbm [thread:$0]  %s277_s12, 64, %s421_s5, [#allocation3]  }
 0x1d5   :  { %328 = dma.done.wait [#allocation3], 64  }
 0x1d6   :  { %329 = vsyncadd [#allocation3], 4294967232 }
 0x1d7   :  { %283 = vsyncpa [#allocation3], 1 }

</bundles_post_ra>
